<compile_context>
chip_gen: v5e
topology: v5e:2x2
jax: 0.10.0
libtpu: 0.0.40
codegen_flags: <defaults>
</compile_context>

<pallas_src>
import functools

import jax
import jax.numpy as jnp
from jax.experimental import pallas as pl
from jax.experimental.pallas import tpu as pltpu

_LANE = 128          # vreg lane width
_LANE_LARGE = 256    # v6e/v7x MXU width; used only for genuinely large dims


def _round_up(n, m):
    return ((n + m - 1) // m) * m


def _lane_pad(d):
    """Pad a hidden/lane dim: 128-multiples, 256-multiples once it is >= 256."""
    return _round_up(d, _LANE_LARGE if d >= _LANE_LARGE else _LANE)


# --------------------------------------------------------------------------- #
# Kernel body
# --------------------------------------------------------------------------- #
def _mlp_kernel(*refs, num_layers, compute_dtype, precision):
    """Fused MLP. refs = [x, W_0..W_{L-1}, b_0..b_{L-1}, out].

    x   : (TB, Din)            compute_dtype  (streamed over batch tiles)
    W_i : (K_i, N_i)           compute_dtype  (grid-resident)
    b_i : (1, N_i)             f32            (grid-resident)
    out : (TB, Dout)           f32
    Hidden widths are lane-padded with zero columns, so padded activation
    columns are tanh(0) = 0 and never contaminate the result.
    """
    x_ref = refs[0]
    w_refs = refs[1:1 + num_layers]
    b_refs = refs[1 + num_layers:1 + 2 * num_layers]
    o_ref = refs[1 + 2 * num_layers]

    h = x_ref[...].astype(compute_dtype)
    for i in range(num_layers):
        y = jnp.dot(h, w_refs[i][...],
                    preferred_element_type=jnp.float32,
                    precision=precision)
        y = y + b_refs[i][...]                      # f32 bias add (row broadcast)
        if i < num_layers - 1:
            h = jnp.tanh(y).astype(compute_dtype)   # f32 tanh on EUP, cast for MXU
        else:
            h = y
    o_ref[...] = h.astype(o_ref.dtype)


# --------------------------------------------------------------------------- #
# Param preparation (call ONCE at init; do not redo per forward call)
# --------------------------------------------------------------------------- #
def pad_encode_params(params, *, compute_dtype=jnp.float32):
    """Pads Encode params once.

    params : list of (W (din, dout) f32, b (dout,) f32), already (in, out).
    Returns list of (W_p, b_p) where:
      * layer 0 keeps its true row count (x is not feature-padded),
      * hidden output widths are lane-padded (zeros),
      * the last layer keeps its true output width (lean writeback),
      * each layer's row count matches the previous layer's padded width.
    """
    n = len(params)
    out = []
    prev_cols = None
    for i, (w, b) in enumerate(params):
        din, dout = w.shape
        rows = din if i == 0 else prev_cols
        cols = dout if i == n - 1 else _lane_pad(dout)
        w_p = jnp.zeros((rows, cols), compute_dtype).at[:din, :dout].set(
            w.astype(compute_dtype))
        b_p = jnp.zeros((1, cols), jnp.float32).at[:, :dout].set(
            b.astype(jnp.float32))
        out.append((w_p, b_p))
        prev_cols = cols
    return out


# --------------------------------------------------------------------------- #
# Forward
# --------------------------------------------------------------------------- #
def encode_forward_padded(x, padded_params, *, batch_tile=None, precision=None):
    """Fused Encode forward on pre-padded params.  x : (B, Din) -> (B, Dout) f32.

    Jit this (see __main__) so the small x batch-pad fuses with surrounding ops.
    """
    w_list = [w for (w, _) in padded_params]
    b_list = [b for (_, b) in padded_params]
    num_layers = len(padded_params)
    compute_dtype = w_list[0].dtype
    itemsize = jnp.dtype(compute_dtype).itemsize

    B, Din = x.shape
    if Din != w_list[0].shape[0]:
        raise ValueError(f"x feature dim {Din} != W0 rows {w_list[0].shape[0]}")
    Dout = w_list[-1].shape[1]

    # dtype-specific sublane packing: f32 -> 8, bf16 -> 16, int8/fp8 -> 32
    pack = 32 // itemsize

    if batch_tile is None:
        batch_tile = min(1024, _round_up(B, pack))
        # v7x megacore: make sure the "parallel" batch axis has >= 2 grid steps
        # whenever B is large enough, so both TensorCores get work.
        if B >= 2 * pack:
            batch_tile = min(batch_tile, _round_up(pl.cdiv(B, 2), pack))
    batch_tile = _round_up(batch_tile, pack)
    Bp = _round_up(B, batch_tile)
    n_tiles = Bp // batch_tile

    x_c = x.astype(compute_dtype)
    if Bp != B:
        x_c = jnp.zeros((Bp, Din), compute_dtype).at[:B].set(x_c)

    # --- BlockSpecs: x/out streamed over batch; params resident in VMEM ------
    in_specs = [pl.BlockSpec((batch_tile, Din), lambda i: (i, 0))]
    for w in w_list:
        in_specs.append(pl.BlockSpec(w.shape, lambda i: (0, 0)))
    for b in b_list:
        in_specs.append(pl.BlockSpec(b.shape, lambda i: (0, 0)))
    out_specs = pl.BlockSpec((batch_tile, Dout), lambda i: (i, 0))

    # --- VMEM budget (explicit: v5e scoped default is only 16 MiB;
    #     v7x physical VMEM is 64 MiB) --------------------------------------
    w_bytes = sum(w.size * itemsize for w in w_list)
    b_bytes = sum(b.size * 4 for b in b_list)
    x_tile_bytes = batch_tile * Din * itemsize
    o_tile_bytes = batch_tile * Dout * 4
    act_bytes = 2 * batch_tile * max(w.shape[1] for w in w_list) * 4
    needed = 2 * (x_tile_bytes + o_tile_bytes + w_bytes + b_bytes) + act_bytes
    vmem_limit = int(min(max(needed + (8 << 20), 16 << 20), 64 << 20))

    # --- realistic cost estimate: weights counted once, x/out useful widths --
    flops = 2 * Bp * sum(w.shape[0] * w.shape[1] for w in w_list)
    transcendentals = Bp * sum(w.shape[1] for w in w_list[:-1])
    bytes_accessed = (B * Din * itemsize + B * Dout * 4 + w_bytes + b_bytes)

    kernel = functools.partial(
        _mlp_kernel, num_layers=num_layers, compute_dtype=compute_dtype,
        precision=precision)

    out_p = pl.pallas_call(
        kernel,
        out_shape=jax.ShapeDtypeStruct((Bp, Dout), jnp.float32),
        grid=(n_tiles,),
        in_specs=in_specs,
        out_specs=out_specs,
        compiler_params=pltpu.CompilerParams(
            dimension_semantics=("parallel",),
            vmem_limit_bytes=vmem_limit),
        cost_estimate=pl.CostEstimate(
            flops=flops,
            transcendentals=transcendentals,
            bytes_accessed=bytes_accessed),
    )(x_c, *w_list, *b_list)

    return out_p[:B] if Bp != B else out_p


def encode_forward(x, params, *, compute_dtype=jnp.float32, batch_tile=None,
                   precision=None):
    """Convenience wrapper over raw params (pads every call).

    Production use: pad once with `pad_encode_params` and call (a jitted)
    `encode_forward_padded`.
    """
    padded = pad_encode_params(params, compute_dtype=compute_dtype)
    return encode_forward_padded(x, padded, batch_tile=batch_tile,
                                 precision=precision)


# --------------------------------------------------------------------------- #
# Reference & init
# --------------------------------------------------------------------------- #
def encode_forward_ref(x, params, *, compute_dtype=jnp.float32):
    """Pure-JAX reference (matches PyTorch exactly for compute_dtype=f32)."""
    n = len(params)
    h = x
    for i, (w, b) in enumerate(params):
        y = jnp.dot(h.astype(compute_dtype), w.astype(compute_dtype),
                    preferred_element_type=jnp.float32) + b
        h = jnp.tanh(y) if i < n - 1 else y
    return h


def init_encode_params(key, layer_size):
    """Deterministic init mirroring nn.Linear default U(-1/sqrt(fan_in), ..).

    Module structure (matches the PyTorch spec):
      Linear(input_dim, hidden_dim), Tanh,
      num_hidden x (Linear(hidden_dim, hidden_dim), Tanh),
      Linear(hidden_dim, output_dim)
    Weights are returned already transposed to (in, out).
    """
    input_dim = layer_size[0]
    hidden_dim = layer_size[1]
    output_dim = layer_size[-1]
    num_hidden = len(layer_size) - 2

    dims = [(input_dim, hidden_dim)]
    dims += [(hidden_dim, hidden_dim)] * num_hidden
    dims += [(hidden_dim, output_dim)]

    params = []
    for (din, dout) in dims:
        key, kw, kb = jax.random.split(key, 3)
        bound = 1.0 / jnp.sqrt(float(din))
        w = jax.random.uniform(kw, (din, dout), jnp.float32, -bound, bound)
        b = jax.random.uniform(kb, (dout,), jnp.float32, -bound, bound)
        params.append((w, b))
    return params


# --------------------------------------------------------------------------- #
if __name__ == "__main__":
    # layer_size -> Linear(16,32), Tanh, Linear(32,32), Tanh, Linear(32,32),
    #               Tanh, Linear(32,8)
    layer_size = [16, 32, 32, 8]
    batch = 8

    key = jax.random.PRNGKey(0)
    key, kx = jax.random.split(key)
    x = jax.random.normal(kx, (batch, layer_size[0]), jnp.float32)
    params = init_encode_params(key, layer_size)

    # Pad params ONCE (hoisted out of the forward path), jit the forward.
    padded_f32 = pad_encode_params(params, compute_dtype=jnp.float32)
    fwd = jax.jit(encode_forward_padded,
                  static_argnames=("batch_tile", "precision"))

    # f32 path: must match the PyTorch-equivalent reference tightly.
    out = jax.block_until_ready(fwd(x, padded_f32))
    ref = encode_forward_ref(x, params)
    assert out.shape == (batch, layer_size[-1])
    assert jnp.allclose(out, ref, atol=1e-5, rtol=1e-5)

    # Larger batch exercising the batched grid + batch padding + slicing.
    key, kx2 = jax.random.split(key)
    x2 = jax.random.normal(kx2, (40, layer_size[0]), jnp.float32)
    out2 = jax.block_until_ready(fwd(x2, padded_f32, batch_tile=16))
    ref2 = encode_forward_ref(x2, params)
    assert out2.shape == (40, layer_size[-1])
    assert jnp.allclose(out2, ref2, atol=1e-5, rtol=1e-5)

    # Default-tile path (exercises the megacore >=2-step cap for B=40).
    out2b = jax.block_until_ready(fwd(x2, padded_f32))
    assert jnp.allclose(out2b, ref2, atol=1e-5, rtol=1e-5)

    # bf16 MXU-input perf mode (recommended on v6e/v7x): f32 accumulation,
    # compare vs a matching bf16 reference.
    padded_bf16 = pad_encode_params(params, compute_dtype=jnp.bfloat16)
    out_bf = jax.block_until_ready(fwd(x2, padded_bf16, batch_tile=16))
    ref_bf = encode_forward_ref(x2, params, compute_dtype=jnp.bfloat16)
    assert jnp.allclose(out_bf, ref_bf, atol=1e-3, rtol=1e-3)

    # Convenience (per-call padding) wrapper still works.
    out_conv = jax.block_until_ready(encode_forward(x, params))
    assert jnp.allclose(out_conv, ref, atol=1e-5, rtol=1e-5)

    print("KERNEL_OK")
</pallas_src>

<mosaic_0001>
module attributes {stable_mosaic.version = 11 : i64} {
  func.func @_mlp_kernel(%arg0: i32, %arg1: memref<8x16xf32, #tpu.memory_space<vmem>>, %arg2: memref<16x128xf32, #tpu.memory_space<vmem>>, %arg3: memref<128x128xf32, #tpu.memory_space<vmem>>, %arg4: memref<128x128xf32, #tpu.memory_space<vmem>>, %arg5: memref<128x8xf32, #tpu.memory_space<vmem>>, %arg6: memref<1x128xf32, #tpu.memory_space<vmem>>, %arg7: memref<1x128xf32, #tpu.memory_space<vmem>>, %arg8: memref<1x128xf32, #tpu.memory_space<vmem>>, %arg9: memref<1x8xf32, #tpu.memory_space<vmem>>, %arg10: memref<8x8xf32, #tpu.memory_space<vmem>>) attributes {dimension_semantics = [#tpu.dimension_semantics<parallel>], iteration_bounds = array<i64: 1>, scalar_prefetch = 0 : i64, scratch_operands = 0 : i64, tpu.core_type = #tpu.core_type<tc>, window_params = [{transform_indices = @transform_0, window_bounds = array<i64: 8, 16>}, {pipeline_mode = #tpu.pipeline_mode<synchronous>, transform_indices = @transform_1, window_bounds = array<i64: 16, 128>}, {pipeline_mode = #tpu.pipeline_mode<synchronous>, transform_indices = @transform_2, window_bounds = array<i64: 128, 128>}, {pipeline_mode = #tpu.pipeline_mode<synchronous>, transform_indices = @transform_3, window_bounds = array<i64: 128, 128>}, {pipeline_mode = #tpu.pipeline_mode<synchronous>, transform_indices = @transform_4, window_bounds = array<i64: 128, 8>}, {pipeline_mode = #tpu.pipeline_mode<synchronous>, transform_indices = @transform_5, window_bounds = array<i64: 1, 128>}, {pipeline_mode = #tpu.pipeline_mode<synchronous>, transform_indices = @transform_6, window_bounds = array<i64: 1, 128>}, {pipeline_mode = #tpu.pipeline_mode<synchronous>, transform_indices = @transform_7, window_bounds = array<i64: 1, 128>}, {pipeline_mode = #tpu.pipeline_mode<synchronous>, transform_indices = @transform_8, window_bounds = array<i64: 1, 8>}, {transform_indices = @transform_9, window_bounds = array<i64: 8, 8>}]} {
    %c0 = arith.constant 0 : index
    %c0_0 = arith.constant 0 : index
    %0 = vector.load %arg1[%c0, %c0_0] : memref<8x16xf32, #tpu.memory_space<vmem>>, vector<8x16xf32>
    %c0_1 = arith.constant 0 : index
    %c0_2 = arith.constant 0 : index
    %1 = vector.load %arg2[%c0_1, %c0_2] : memref<16x128xf32, #tpu.memory_space<vmem>>, vector<16x128xf32>
    %cst = arith.constant dense<0.000000e+00> : vector<8x128xf32>
    %2 = tpu.matmul %0, %1, %cst {dimension_numbers = #tpu.dot_dimension_numbers<[1], [0], [0], [1], [0, 0, 1, 1], [], []>} : vector<8x16xf32>, vector<16x128xf32>, vector<8x128xf32> -> vector<8x128xf32>
    %c0_3 = arith.constant 0 : index
    %c0_4 = arith.constant 0 : index
    %3 = vector.load %arg6[%c0_3, %c0_4] : memref<1x128xf32, #tpu.memory_space<vmem>>, vector<1x128xf32>
    %4 = vector.broadcast %3 : vector<1x128xf32> to vector<8x128xf32>
    %5 = arith.addf %2, %4 : vector<8x128xf32>
    %6 = math.tanh %5 : vector<8x128xf32>
    %c0_5 = arith.constant 0 : index
    %c0_6 = arith.constant 0 : index
    %7 = vector.load %arg3[%c0_5, %c0_6] : memref<128x128xf32, #tpu.memory_space<vmem>>, vector<128x128xf32>
    %cst_7 = arith.constant dense<0.000000e+00> : vector<8x128xf32>
    %8 = tpu.matmul %6, %7, %cst_7 {dimension_numbers = #tpu.dot_dimension_numbers<[1], [0], [0], [1], [0, 0, 1, 1], [], []>} : vector<8x128xf32>, vector<128x128xf32>, vector<8x128xf32> -> vector<8x128xf32>
    %c0_8 = arith.constant 0 : index
    %c0_9 = arith.constant 0 : index
    %9 = vector.load %arg7[%c0_8, %c0_9] : memref<1x128xf32, #tpu.memory_space<vmem>>, vector<1x128xf32>
    %10 = vector.broadcast %9 : vector<1x128xf32> to vector<8x128xf32>
    %11 = arith.addf %8, %10 : vector<8x128xf32>
    %12 = math.tanh %11 : vector<8x128xf32>
    %c0_10 = arith.constant 0 : index
    %c0_11 = arith.constant 0 : index
    %13 = vector.load %arg4[%c0_10, %c0_11] : memref<128x128xf32, #tpu.memory_space<vmem>>, vector<128x128xf32>
    %cst_12 = arith.constant dense<0.000000e+00> : vector<8x128xf32>
    %14 = tpu.matmul %12, %13, %cst_12 {dimension_numbers = #tpu.dot_dimension_numbers<[1], [0], [0], [1], [0, 0, 1, 1], [], []>} : vector<8x128xf32>, vector<128x128xf32>, vector<8x128xf32> -> vector<8x128xf32>
    %c0_13 = arith.constant 0 : index
    %c0_14 = arith.constant 0 : index
    %15 = vector.load %arg8[%c0_13, %c0_14] : memref<1x128xf32, #tpu.memory_space<vmem>>, vector<1x128xf32>
    %16 = vector.broadcast %15 : vector<1x128xf32> to vector<8x128xf32>
    %17 = arith.addf %14, %16 : vector<8x128xf32>
    %18 = math.tanh %17 : vector<8x128xf32>
    %c0_15 = arith.constant 0 : index
    %c0_16 = arith.constant 0 : index
    %19 = vector.load %arg5[%c0_15, %c0_16] : memref<128x8xf32, #tpu.memory_space<vmem>>, vector<128x8xf32>
    %cst_17 = arith.constant dense<0.000000e+00> : vector<8x8xf32>
    %20 = tpu.matmul %18, %19, %cst_17 {dimension_numbers = #tpu.dot_dimension_numbers<[1], [0], [0], [1], [0, 0, 1, 1], [], []>} : vector<8x128xf32>, vector<128x8xf32>, vector<8x8xf32> -> vector<8x8xf32>
    %c0_18 = arith.constant 0 : index
    %c0_19 = arith.constant 0 : index
    %21 = vector.load %arg9[%c0_18, %c0_19] : memref<1x8xf32, #tpu.memory_space<vmem>>, vector<1x8xf32>
    %22 = vector.broadcast %21 : vector<1x8xf32> to vector<8x8xf32>
    %23 = arith.addf %20, %22 : vector<8x8xf32>
    %c0_20 = arith.constant 0 : index
    %c0_21 = arith.constant 0 : index
    %24 = vector.load %arg10[%c0_20, %c0_21] : memref<8x8xf32, #tpu.memory_space<vmem>>, vector<8x8xf32>
    tpu.vector_store %arg10[%c0_20, %c0_21], %23 {strides = array<i32>} : memref<8x8xf32, #tpu.memory_space<vmem>>, vector<8x8xf32>,
    return
  }
  func.func @transform_0(%arg0: i32) -> (i32, i32) {
    %c0_i32 = arith.constant 0 : i32
    %c0_i32_0 = arith.constant 0 : i32
    return %arg0, %c0_i32 : i32, i32
  }
  func.func @transform_1(%arg0: i32) -> (i32, i32) {
    %c0_i32 = arith.constant 0 : i32
    %c0_i32_0 = arith.constant 0 : i32
    %c0_i32_1 = arith.constant 0 : i32
    return %c0_i32, %c0_i32_0 : i32, i32
  }
  func.func @transform_2(%arg0: i32) -> (i32, i32) {
    %c0_i32 = arith.constant 0 : i32
    %c0_i32_0 = arith.constant 0 : i32
    %c0_i32_1 = arith.constant 0 : i32
    return %c0_i32, %c0_i32_0 : i32, i32
  }
  func.func @transform_3(%arg0: i32) -> (i32, i32) {
    %c0_i32 = arith.constant 0 : i32
    %c0_i32_0 = arith.constant 0 : i32
    %c0_i32_1 = arith.constant 0 : i32
    return %c0_i32, %c0_i32_0 : i32, i32
  }
  func.func @transform_4(%arg0: i32) -> (i32, i32) {
    %c0_i32 = arith.constant 0 : i32
    %c0_i32_0 = arith.constant 0 : i32
    %c0_i32_1 = arith.constant 0 : i32
    return %c0_i32, %c0_i32_0 : i32, i32
  }
  func.func @transform_5(%arg0: i32) -> (i32, i32) {
    %c0_i32 = arith.constant 0 : i32
    %c0_i32_0 = arith.constant 0 : i32
    %c0_i32_1 = arith.constant 0 : i32
    return %c0_i32, %c0_i32_0 : i32, i32
  }
  func.func @transform_6(%arg0: i32) -> (i32, i32) {
    %c0_i32 = arith.constant 0 : i32
    %c0_i32_0 = arith.constant 0 : i32
    %c0_i32_1 = arith.constant 0 : i32
    return %c0_i32, %c0_i32_0 : i32, i32
  }
  func.func @transform_7(%arg0: i32) -> (i32, i32) {
    %c0_i32 = arith.constant 0 : i32
    %c0_i32_0 = arith.constant 0 : i32
    %c0_i32_1 = arith.constant 0 : i32
    return %c0_i32, %c0_i32_0 : i32, i32
  }
  func.func @transform_8(%arg0: i32) -> (i32, i32) {
    %c0_i32 = arith.constant 0 : i32
    %c0_i32_0 = arith.constant 0 : i32
    %c0_i32_1 = arith.constant 0 : i32
    return %c0_i32, %c0_i32_0 : i32, i32
  }
  func.func @transform_9(%arg0: i32) -> (i32, i32) {
    %c0_i32 = arith.constant 0 : i32
    %c0_i32_0 = arith.constant 0 : i32
    return %arg0, %c0_i32 : i32, i32
  }
}

</mosaic_0001>

<bundles_post_ra>
// kernel: encode_forward_padded.1
= control target key start
LH: loop header
LB: loop body
LE: loop exit
PB: predicated region body
PF: predicated region fallthrough
CT: control target
= control target key end

     0   :  { %14 = vsyncpa [#allocation3], 0  ;;  %s508_s0 = inlined_call_operand.vmem [shape: f32[8,16], index: 0, kind: input, shape index: {}]   ;;  %s509_s1 = inlined_call_operand.hbm [shape: f32[16,128], index: 1, kind: input, shape index: {}]   ;;  %s510_s2 = inlined_call_operand.vmem [shape: f32[128,128], index: 2, kind: input, shape index: {}]   ;;  %s511_s3 = inlined_call_operand.hbm [shape: f32[128,128], index: 3, kind: input, shape index: {}]   ;;  %s512_s4 = inlined_call_operand.vmem [shape: f32[128,8], index: 4, kind: input, shape index: {}]   ;;  %s513_s5 = inlined_call_operand.vmem [shape: f32[1,128], index: 5, kind: input, shape index: {}]   ;;  %s514_s6 = inlined_call_operand.vmem [shape: f32[1,128], index: 6, kind: input, shape index: {}]   ;;  %s515_s7 = inlined_call_operand.vmem [shape: f32[1,128], index: 7, kind: input, shape index: {}]   ;;  %s516_s8 = inlined_call_operand.vmem [shape: f32[1,8], index: 8, kind: input, shape index: {}]   ;;  %s517_s9 = inlined_call_operand.hbm [shape: f32[8,8], index: 9, kind: output, shape index: {}]  }
   0x1   :  { %15 = vsyncpa [#allocation6], 0 }
   0x2   :  { %16 = vsyncpa [#allocation4], 0  ;;  %s23_s11 = sshll.u32 %s509_s1, 4  ;;  %s333_s12 = smov [#allocation2]   ;;  %s24_s11 = int_to_ptr.hbm [resolvable:$true] %s23_s11 }
   0x3   :  { %s25_s13 = sshll.u32 %s333_s12, 4  ;;  %s38_s16 = sshll.u32 %s511_s3, 4  ;;  %s26_s13 = int_to_ptr.vmem [resolvable:$true] %s25_s13  ;;  %s39_s16 = int_to_ptr.hbm [resolvable:$true] %s38_s16 }
   0x4   :  { %s334_s17 = smov 128   ;;  %s335_s18 = smov 8  }
   0x5   :  { %31 = dma.hbm_to_vmem [thread:$0]  %s24_s11, 256, %s26_s13, [#allocation3], %s334_s17, %s334_s17, %s335_s18  }
   0x6   :  { %s336_s19 = smov [#allocation5]  }
   0x7   :  { %s40_s20 = sshll.u32 %s336_s19, 4  ;;  %s41_s20 = int_to_ptr.vmem [resolvable:$true] %s40_s20 }
   0x8   :  { %46 = dma.hbm_to_vmem [thread:$0]  %s39_s16, 2048, %s41_s20, [#allocation6], %s334_s17, %s334_s17, %s335_s18  }
   0x9   :  { %327 = dma.done.wait [#allocation3], 256  }
   0xa   :  { %328 = vsyncadd [#allocation3], 4294967040 }
   0xb   :  { %329 = dma.done.wait [#allocation6], 2048  }
   0xc   :  { %330 = vsyncadd [#allocation6], 4294965248  ;;  %v67_v0 = vld [vmem:[#allocation2 + $0x8] sm:$0xff]  ;;  %v66_v1 = vld [vmem:[#allocation2] sm:$0xff]  ;;  %vm72_vm0 = vcmask 130048   ;;  %s337_s18 = smov [#allocation7]  }
   0xd   :  { %90 = vmatpush.msra.mxu0 %v67_v0  ;;  %v65_v2 = vld [vmem:[%s508_s0] sm:$0xff]  ;;  %v112_v3 = vld [vmem:[%s510_s2 + $0x78] sm:$0xff]  ;;  %v111_v4 = vld [vmem:[%s510_s2 + $0x70] sm:$0xff]  ;;  %s226_s19 = sshll.u32 %s337_s18, 4  ;;  %vm219_vm1 = vcmask 64512   ;;  %s227_s19 = int_to_ptr.vmem [resolvable:$true] %s226_s19 }
   0xe   :  { %117 = vmatpush.msra.mxu1 %v112_v3  ;;  %v110_v5 = vld [vmem:[%s510_s2 + $0x68] sm:$0xff]  ;;  %v109_v6 = vld [vmem:[%s510_s2 + $0x60] sm:$0xff]  ;;  %v108_v7 = vld [vmem:[%s510_s2 + $0x58] sm:$0xff] }
   0xf   :  { %91 = vmatpush.msra.mxu0 %v66_v1  ;;  %v107_v8 = vld [vmem:[%s510_s2 + $0x50] sm:$0xff]  ;;  %v106_v9 = vld [vmem:[%s510_s2 + $0x48] sm:$0xff]  ;;  %v105_v10 = vld [vmem:[%s510_s2 + $0x40] sm:$0xff] }
  0x10   :  { %239 = vmatmul.msk.f32.vlgmr.msra.gmra.mxu0 %vm72_vm0, %v65_v2  ;;  %118 = vmatpush.msra.mxu1 %v111_v4  ;;  %v104_v11 = vld [vmem:[%s510_s2 + $0x38] sm:$0xff]  ;;  %v103_v12 = vld [vmem:[%s510_s2 + $0x30] sm:$0xff]  ;;  %v102_v13 = vld [vmem:[%s510_s2 + $0x28] sm:$0xff] }
  0x11   :  { %v101_v14 = vld [vmem:[%s510_s2 + $0x20] sm:$0xff]  ;;  %v100_v15 = vld [vmem:[%s510_s2 + $0x18] sm:$0xff]  ;;  %v99_v16 = vld [vmem:[%s510_s2 + $0x10] sm:$0xff] }
  0x12   :  { %119 = vmatpush.msra.mxu1 %v110_v5  ;;  %v98_v17 = vld [vmem:[%s510_s2 + $0x8] sm:$0xff]  ;;  %v97_v18 = vld [vmem:[%s510_s2] sm:$0xff]  ;;  %v151_v21 = vld [vmem:[#allocation5 + $0x68] sm:$0xff] }
  0x13   :  { %v153_v19 = vld [vmem:[#allocation5 + $0x78] sm:$0xff]  ;;  %v152_v20 = vld [vmem:[#allocation5 + $0x70] sm:$0xff]  ;;  %v150_v22 = vld [vmem:[#allocation5 + $0x60] sm:$0xff] }
  0x14   :  { %120 = vmatpush.msra.mxu1 %v109_v6  ;;  %158 = vmatpush.msra.mxu2 %v153_v19  ;;  %v149_v23 = vld [vmem:[#allocation5 + $0x58] sm:$0xff]  ;;  %v148_v24 = vld [vmem:[#allocation5 + $0x50] sm:$0xff]  ;;  %v147_v25 = vld [vmem:[#allocation5 + $0x48] sm:$0xff] }
  0x15   :  { %v146_v26 = vld [vmem:[#allocation5 + $0x40] sm:$0xff]  ;;  %v145_v27 = vld [vmem:[#allocation5 + $0x38] sm:$0xff]  ;;  %v144_v28 = vld [vmem:[#allocation5 + $0x30] sm:$0xff] }
  0x16   :  { %121 = vmatpush.msra.mxu1 %v108_v7  ;;  %159 = vmatpush.msra.mxu2 %v152_v20  ;;  %v143_v29 = vld [vmem:[#allocation5 + $0x28] sm:$0xff]  ;;  %v245_v30 = vld [vmem:[%s513_s5] ss:$0 sm:$0xff]  ;;  %v142_v34 = vld [vmem:[#allocation5 + $0x20] sm:$0xff] }
  0x17   :  { %v141_v35 = vld [vmem:[#allocation5 + $0x18] sm:$0xff]  ;;  %v140_v36 = vld [vmem:[#allocation5 + $0x10] sm:$0xff]  ;;  %v139_v37 = vld [vmem:[#allocation5 + $0x8] sm:$0xff] }
  0x18   :  { %122 = vmatpush.msra.mxu1 %v107_v8  ;;  %160 = vmatpush.msra.mxu2 %v151_v21  ;;  %v138_v38 = vld [vmem:[#allocation5] sm:$0xff]  ;;  %v194_v39 = vld [vmem:[%s512_s4 + $0x78] sm:$0xff]  ;;  %v192_v41 = vld [vmem:[%s512_s4 + $0x68] sm:$0xff] }
  0x19   :  { %v193_v40 = vld [vmem:[%s512_s4 + $0x70] sm:$0xff]  ;;  %199 = vmatpush.msra.mxu3 %v194_v39  ;;  %v191_v42 = vld [vmem:[%s512_s4 + $0x60] sm:$0xff]  ;;  %v190_v43 = vld [vmem:[%s512_s4 + $0x58] sm:$0xff] }
  0x1a   :  { %123 = vmatpush.msra.mxu1 %v106_v9  ;;  %161 = vmatpush.msra.mxu2 %v150_v22  ;;  %v189_v44 = vld [vmem:[%s512_s4 + $0x50] sm:$0xff]  ;;  %v188_v45 = vld [vmem:[%s512_s4 + $0x48] sm:$0xff]  ;;  %v187_v46 = vld [vmem:[%s512_s4 + $0x40] sm:$0xff] }
  0x1b   :  { %200 = vmatpush.msra.mxu3 %v193_v40  ;;  %v186_v47 = vld [vmem:[%s512_s4 + $0x38] sm:$0xff]  ;;  %v185_v48 = vld [vmem:[%s512_s4 + $0x30] sm:$0xff]  ;;  %v184_v49 = vld [vmem:[%s512_s4 + $0x28] sm:$0xff] }
  0x1c   :  { %124 = vmatpush.msra.mxu1 %v105_v10  ;;  %162 = vmatpush.msra.mxu2 %v149_v23  ;;  %v246_v50 = vld [vmem:[%s514_s6] ss:$0 sm:$0xff]  ;;  %v182_v55 = vld [vmem:[%s512_s4 + $0x18] sm:$0xff]  ;;  %v181_v56 = vld [vmem:[%s512_s4 + $0x10] sm:$0xff] }
  0x1d   :  { %201 = vmatpush.msra.mxu3 %v192_v41  ;;  %v183_v54 = vld [vmem:[%s512_s4 + $0x20] sm:$0xff]  ;;  %v180_v57 = vld [vmem:[%s512_s4 + $0x8] sm:$0xff] }
  0x1e   :  { %125 = vmatpush.msra.mxu1 %v104_v11  ;;  %163 = vmatpush.msra.mxu2 %v148_v24  ;;  %v179_v58 = vld [vmem:[%s512_s4] sm:$0xff]  ;;  %s228_s4 = sshll.u32 %s517_s9, 4  ;;  %s229_s4 = int_to_ptr.hbm [resolvable:$true] %s228_s4 }
  0x1f   :  { %202 = vmatpush.msra.mxu3 %v191_v42  ;;  %v247_v59 = vld [vmem:[%s515_s7] ss:$0 sm:$0xff] }
  0x20   :  { %126 = vmatpush.msra.mxu1 %v103_v12  ;;  %164 = vmatpush.msra.mxu2 %v147_v25  ;;  %v248_v63 = vld [vmem:[%s516_s8] ss:$0 sm:$0xff] }
  0x21   :  { %203 = vmatpush.msra.mxu3 %v190_v43 }
  0x22   :  { %127 = vmatpush.msra.mxu1 %v102_v13  ;;  %165 = vmatpush.msra.mxu2 %v146_v26 }
  0x23   :  { %204 = vmatpush.msra.mxu3 %v189_v44 }
  0x24   :  { %128 = vmatpush.msra.mxu1 %v101_v14  ;;  %166 = vmatpush.msra.mxu2 %v145_v27 }
  0x25   :  { %205 = vmatpush.msra.mxu3 %v188_v45 }
  0x26   :  { %129 = vmatpush.msra.mxu1 %v100_v15  ;;  %167 = vmatpush.msra.mxu2 %v144_v28 }
  0x27   :  { %206 = vmatpush.msra.mxu3 %v187_v46 }
  0x28   :  { %130 = vmatpush.msra.mxu1 %v99_v16  ;;  %168 = vmatpush.msra.mxu2 %v143_v29 }
  0x29   :  { %207 = vmatpush.msra.mxu3 %v186_v47 }
  0x2a   :  { %131 = vmatpush.msra.mxu1 %v98_v17  ;;  %169 = vmatpush.msra.mxu2 %v142_v34 }
  0x2b   :  { %208 = vmatpush.msra.mxu3 %v185_v48 }
  0x2c   :  { %132 = vmatpush.msra.mxu1 %v97_v18  ;;  %170 = vmatpush.msra.mxu2 %v141_v35 }
  0x2d   :  { %209 = vmatpush.msra.mxu3 %v184_v49 }
  0x2e   :  { %171 = vmatpush.msra.mxu2 %v140_v36 }
  0x2f   :  { %210 = vmatpush.msra.mxu3 %v183_v54 }
  0x30   :  { %172 = vmatpush.msra.mxu2 %v139_v37 }
  0x31   :  { %211 = vmatpush.msra.mxu3 %v182_v55 }
  0x32   :  { %173 = vmatpush.msra.mxu2 %v138_v38 }
  0x33   :  { %212 = vmatpush.msra.mxu3 %v181_v56 }
  0x35   :  { %213 = vmatpush.msra.mxu3 %v180_v57 }
  0x37   :  { %214 = vmatpush.msra.mxu3 %v179_v58 }
  0x8d   :  { %v93_v31 = vpop.f32.mrf.mxu0 }
  0x8e   :  { %v94_v32 = vadd.f32 %v245_v30, %v93_v31 }
  0x90   :  { %249 = vtanh.f32 %v94_v32 }
  0x96   :  { %v250_v33 = vpop.eup %249 }
  0x97   :  { %133 = vmatmul.f32.vlgmr.msra.gmra.mxu1 %v250_v33 }
 0x114   :  { %v134_v51 = vpop.f32.mrf.mxu1 }
 0x115   :  { %v135_v52 = vadd.f32 %v246_v50, %v134_v51 }
 0x117   :  { %251 = vtanh.f32 %v135_v52 }
 0x11d   :  { %v252_v53 = vpop.eup %251 }
 0x11e   :  { %174 = vmatmul.f32.vlgmr.msra.gmra.mxu2 %v252_v53 }
 0x1a1   :  { %v175_v60 = vpop.f32.mrf.mxu2 }
 0x1a2   :  { %v176_v61 = vadd.f32 %v247_v59, %v175_v60 }
 0x1a4   :  { %253 = vtanh.f32 %v176_v61 }
 0x1aa   :  { %v254_v62 = vpop.eup %253 }
 0x1ab   :  { %215 = vmatmul.f32.vlgmr.msra.gmra.mxu3 %v254_v62 }
 0x22e   :  { %v216_v0 = vpop.f32.mrf.mxu3 }
 0x22f   :  { %v217_v1 = vadd.f32 %v248_v63, %v216_v0 }
 0x231   :  { %220 = vst.msk [vmem:[#allocation7] sm:$0xff] %vm219_vm1, %v217_v1 }
 0x232   :  { %231 = dma.vmem_to_hbm [thread:$0]  %s227_s19, 128, %s229_s4, [#allocation4]  }
 0x233   :  { %331 = dma.done.wait [#allocation4], 128  }
 0x234   :  { %332 = vsyncadd [#allocation4], 4294967168 }
 0x235   :  { %236 = vsyncpa [#allocation3], 1 }
 0x236   :  { %237 = vsyncpa [#allocation6], 1 }
 0x237   :  { %238 = vsyncpa [#allocation4], 1 }

</bundles_post_ra>
